<compile_context>
chip_gen: v7x
topology: tpu7x:2x2x1
jax: 0.10.0
libtpu: 0.0.40
codegen_flags: <defaults>
</compile_context>

<pallas_src>
import jax
import jax.numpy as jnp
from jax.experimental import pallas as pl
from jax.experimental.pallas import tpu as pltpu

EPS = 1e-5  # nn.BatchNorm2d default eps

_CP = pltpu.CompilerParams(dimension_semantics=("parallel",))


# ---------------------------------------------------------------------------
# Pallas kernels
# ---------------------------------------------------------------------------

def _maxpool2_kernel(r0_ref, r1_ref, o_ref):
    """2x2/stride-2 max pool of one output row (two input rows)."""
    n, _, w, c = r0_ref.shape
    wo = w // 2
    m = jnp.maximum(r0_ref[...], r1_ref[...])        # (n, 1, w, c)
    m = m.reshape(n, wo, 2, c)
    o_ref[...] = jnp.max(m, axis=2).reshape(n, 1, wo, c)


def _conv3x3_bn_relu_kernel(top_ref, mid_ref, bot_ref, w_ref, b_ref, o_ref):
    """One output row of: 3x3 conv (pad=1, BN folded into w/b) + ReLU.

    top/mid/bot: (N, 1, W+2, Cin) rows of the zero-padded input.
    w_ref:       (9, Cin, Cout)  tap-major folded weights.
    b_ref:       (1, Cout)       folded bias (f32).
    o_ref:       (N, 1, W, Cout)
    """
    n, _, _, cin = top_ref.shape
    _, _, wout, cout = o_ref.shape
    rows = (top_ref, mid_ref, bot_ref)
    acc = jnp.zeros((n * wout, cout), jnp.float32)
    for ky in range(3):
        rowv = rows[ky][:, 0, :, :]                   # (n, W+2, cin)
        for kx in range(3):
            patch = rowv[:, kx:kx + wout, :].reshape(n * wout, cin)
            acc = acc + jnp.dot(patch, w_ref[3 * ky + kx],
                                preferred_element_type=jnp.float32)
    y = acc + b_ref[...]
    o_ref[...] = jnp.maximum(y, 0.0).reshape(n, 1, wout, cout).astype(o_ref.dtype)


# ---------------------------------------------------------------------------
# pallas_call wrappers (row-tiled grids, weights/bias grid-invariant)
# ---------------------------------------------------------------------------

def maxpool2(x_nhwc):
    n, h, w, c = x_nhwc.shape
    ho, wo = h // 2, w // 2
    return pl.pallas_call(
        _maxpool2_kernel,
        out_shape=jax.ShapeDtypeStruct((n, ho, wo, c), x_nhwc.dtype),
        grid=(ho,),
        in_specs=[pl.BlockSpec((n, 1, w, c), lambda i: (0, 2 * i, 0, 0)),
                  pl.BlockSpec((n, 1, w, c), lambda i: (0, 2 * i + 1, 0, 0))],
        out_specs=pl.BlockSpec((n, 1, wo, c), lambda i: (0, i, 0, 0)),
        compiler_params=_CP,
    )(x_nhwc, x_nhwc)


def conv3x3_bn_relu(x_nhwc, wtaps, bias, out_dtype):
    n, h, w, cin = x_nhwc.shape
    cout = wtaps.shape[-1]
    xp = jnp.pad(x_nhwc, ((0, 0), (1, 1), (1, 1), (0, 0)))   # (n, h+2, w+2, cin)
    wp = w + 2
    wtaps = wtaps.astype(x_nhwc.dtype)
    bias = bias.astype(jnp.float32)

    def row_spec(off):
        return pl.BlockSpec((n, 1, wp, cin), lambda i: (0, i + off, 0, 0))

    return pl.pallas_call(
        _conv3x3_bn_relu_kernel,
        out_shape=jax.ShapeDtypeStruct((n, h, w, cout), out_dtype),
        grid=(h,),
        in_specs=[row_spec(0), row_spec(1), row_spec(2),
                  pl.BlockSpec((9, cin, cout), lambda i: (0, 0, 0)),
                  pl.BlockSpec((1, cout), lambda i: (0, 0))],
        out_specs=pl.BlockSpec((n, 1, w, cout), lambda i: (0, i, 0, 0)),
        compiler_params=_CP,
    )(xp, xp, xp, wtaps, bias)


# ---------------------------------------------------------------------------
# Parameter prep (hoisted out of the forward): BN fold + weight re-layout
# ---------------------------------------------------------------------------

def prepare_params(raw):
    """Fold eval-mode BN into conv weights/bias; weights -> (9, Cin, Cout)."""
    def fold(w, gamma, beta, mean, var):
        scale = gamma * jax.lax.rsqrt(var + EPS)                  # (Cout,)
        o, i, _, _ = w.shape
        wtaps = jnp.transpose(w, (2, 3, 1, 0)).reshape(9, i, o) * scale
        bias = (beta - mean * scale).reshape(1, o)
        return wtaps.astype(jnp.float32), bias.astype(jnp.float32)

    w1, b1 = fold(raw["w1"], raw["bn1_gamma"], raw["bn1_beta"],
                  raw["bn1_mean"], raw["bn1_var"])
    w2, b2 = fold(raw["w2"], raw["bn2_gamma"], raw["bn2_beta"],
                  raw["bn2_mean"], raw["bn2_var"])
    return {"w1": w1, "b1": b1, "w2": w2, "b2": b2}


# ---------------------------------------------------------------------------
# Down forward (Pallas)
# ---------------------------------------------------------------------------

def down_forward(x_nchw, prep, compute_dtype=jnp.float32):
    n, cin, h, w = x_nchw.shape
    assert h % 2 == 0 and w % 2 == 0, "MaxPool2d(2) expects even spatial dims"
    x = jnp.transpose(x_nchw, (0, 2, 3, 1)).astype(compute_dtype)   # NHWC
    pooled = maxpool2(x)                                            # (n,h/2,w/2,cin)
    h1 = conv3x3_bn_relu(pooled, prep["w1"], prep["b1"], out_dtype=compute_dtype)
    out = conv3x3_bn_relu(h1, prep["w2"], prep["b2"], out_dtype=jnp.float32)
    return jnp.transpose(out, (0, 3, 1, 2))                         # NCHW


# ---------------------------------------------------------------------------
# Pure-JAX reference (correctness check only)
# ---------------------------------------------------------------------------

def down_reference(x_nchw, raw):
    x = jnp.transpose(x_nchw, (0, 2, 3, 1)).astype(jnp.float32)
    pooled = jax.lax.reduce_window(x, -jnp.inf, jax.lax.max,
                                   (1, 2, 2, 1), (1, 2, 2, 1), "VALID")

    def conv_bn_relu(inp, w, g, be, m, v):
        w_hwio = jnp.transpose(w, (2, 3, 1, 0))
        y = jax.lax.conv_general_dilated(
            inp, w_hwio, (1, 1), [(1, 1), (1, 1)],
            dimension_numbers=("NHWC", "HWIO", "NHWC"),
            precision=jax.lax.Precision.HIGHEST)
        y = (y - m) * jax.lax.rsqrt(v + EPS) * g + be
        return jnp.maximum(y, 0.0)

    h1 = conv_bn_relu(pooled, raw["w1"], raw["bn1_gamma"], raw["bn1_beta"],
                      raw["bn1_mean"], raw["bn1_var"])
    h2 = conv_bn_relu(h1, raw["w2"], raw["bn2_gamma"], raw["bn2_beta"],
                      raw["bn2_mean"], raw["bn2_var"])
    return jnp.transpose(h2, (0, 3, 1, 2))


# ---------------------------------------------------------------------------
# Deterministic parameter init (PyTorch weight layout: (O, I, 3, 3))
# ---------------------------------------------------------------------------

def init_params(key, in_channels, out_channels, mid_channels=None):
    if mid_channels is None:
        mid_channels = out_channels
    ks = jax.random.split(key, 10)

    def w(k, shape, scale=0.1):
        return (scale * jax.random.normal(k, shape)).astype(jnp.float32)

    p = {
        "w1": w(ks[0], (mid_channels, in_channels, 3, 3)),
        "bn1_gamma": 1.0 + 0.1 * jax.random.normal(ks[1], (mid_channels,)),
        "bn1_beta": 0.1 * jax.random.normal(ks[2], (mid_channels,)),
        "bn1_mean": 0.1 * jax.random.normal(ks[3], (mid_channels,)),
        "bn1_var": jax.random.uniform(ks[4], (mid_channels,), minval=0.5, maxval=1.5),
        "w2": w(ks[5], (out_channels, mid_channels, 3, 3)),
        "bn2_gamma": 1.0 + 0.1 * jax.random.normal(ks[6], (out_channels,)),
        "bn2_beta": 0.1 * jax.random.normal(ks[7], (out_channels,)),
        "bn2_mean": 0.1 * jax.random.normal(ks[8], (out_channels,)),
        "bn2_var": jax.random.uniform(ks[9], (out_channels,), minval=0.5, maxval=1.5),
    }
    return {k: v.astype(jnp.float32) for k, v in p.items()}


if __name__ == "__main__":
    N, Cin, Cout, H, W = 2, 4, 8, 16, 16
    key = jax.random.PRNGKey(0)
    kx, kp = jax.random.split(key)
    x = jax.random.normal(kx, (N, Cin, H, W), dtype=jnp.float32)
    raw = init_params(kp, Cin, Cout)
    prep = prepare_params(raw)

    ref = jax.block_until_ready(down_reference(x, raw))

    # f32 compute path (tight check).
    out = jax.block_until_ready(down_forward(x, prep, compute_dtype=jnp.float32))
    assert out.shape == (N, Cout, H // 2, W // 2), out.shape
    err = float(jnp.max(jnp.abs(out - ref)))
    assert err < 1e-3, f"f32 max abs error {err}"

    # bf16 compute path (MXU-friendly; f32 accumulation), looser tolerance.
    out_bf = jax.block_until_ready(down_forward(x, prep, compute_dtype=jnp.bfloat16))
    err_bf = float(jnp.max(jnp.abs(out_bf - ref)))
    assert err_bf < 5e-2, f"bf16 max abs error {err_bf}"

    print("KERNEL_OK")
</pallas_src>

<mosaic_0001>
module attributes {stable_mosaic.version = 11 : i64} {
  func.func @_maxpool2_kernel(%arg0: i32, %arg1: memref<2x1x16x4xf32, #tpu.memory_space<vmem>>, %arg2: memref<2x1x16x4xf32, #tpu.memory_space<vmem>>, %arg3: memref<2x1x8x4xf32, #tpu.memory_space<vmem>>) attributes {dimension_semantics = [#tpu.dimension_semantics<parallel>], iteration_bounds = array<i64: 8>, scalar_prefetch = 0 : i64, scratch_operands = 0 : i64, tpu.core_type = #tpu.core_type<tc>, window_params = [{transform_indices = @transform_0, window_bounds = array<i64: 2, 1, 16, 4>}, {transform_indices = @transform_1, window_bounds = array<i64: 2, 1, 16, 4>}, {transform_indices = @transform_2, window_bounds = array<i64: 2, 1, 8, 4>}]} {
    %c0 = arith.constant 0 : index
    %c0_0 = arith.constant 0 : index
    %c0_1 = arith.constant 0 : index
    %c0_2 = arith.constant 0 : index
    %0 = vector.load %arg1[%c0, %c0_0, %c0_1, %c0_2] : memref<2x1x16x4xf32, #tpu.memory_space<vmem>>, vector<2x1x16x4xf32>
    %c0_3 = arith.constant 0 : index
    %c0_4 = arith.constant 0 : index
    %c0_5 = arith.constant 0 : index
    %c0_6 = arith.constant 0 : index
    %1 = vector.load %arg2[%c0_3, %c0_4, %c0_5, %c0_6] : memref<2x1x16x4xf32, #tpu.memory_space<vmem>>, vector<2x1x16x4xf32>
    %2 = arith.maximumf %0, %1 : vector<2x1x16x4xf32>
    %3 = vector.shape_cast %2 : vector<2x1x16x4xf32> to vector<2x8x2x4xf32>
    %cst = arith.constant dense<0xFF800000> : vector<2x8x4xf32>
    %4 = vector.multi_reduction <maximumf>, %3, %cst [2] : vector<2x8x2x4xf32> to vector<2x8x4xf32>
    %5 = vector.shape_cast %4 : vector<2x8x4xf32> to vector<2x1x8x4xf32>
    %c0_7 = arith.constant 0 : index
    %c0_8 = arith.constant 0 : index
    %c0_9 = arith.constant 0 : index
    %c0_10 = arith.constant 0 : index
    %6 = vector.load %arg3[%c0_7, %c0_8, %c0_9, %c0_10] : memref<2x1x8x4xf32, #tpu.memory_space<vmem>>, vector<2x1x8x4xf32>
    tpu.vector_store %arg3[%c0_7, %c0_8, %c0_9, %c0_10], %5 {strides = array<i32>} : memref<2x1x8x4xf32, #tpu.memory_space<vmem>>, vector<2x1x8x4xf32>,
    return
  }
  func.func @transform_0(%arg0: i32) -> (i32, i32, i32, i32) {
    %c2_i32 = arith.constant 2 : i32
    %0 = arith.muli %c2_i32, %arg0 : i32
    %c0_i32 = arith.constant 0 : i32
    %c0_i32_0 = arith.constant 0 : i32
    %c0_i32_1 = arith.constant 0 : i32
    %c0_i32_2 = arith.constant 0 : i32
    return %c0_i32, %0, %c0_i32_0, %c0_i32_1 : i32, i32, i32, i32
  }
  func.func @transform_1(%arg0: i32) -> (i32, i32, i32, i32) {
    %c2_i32 = arith.constant 2 : i32
    %0 = arith.muli %c2_i32, %arg0 : i32
    %c1_i32 = arith.constant 1 : i32
    %1 = arith.addi %0, %c1_i32 : i32
    %c0_i32 = arith.constant 0 : i32
    %c0_i32_0 = arith.constant 0 : i32
    %c0_i32_1 = arith.constant 0 : i32
    %c0_i32_2 = arith.constant 0 : i32
    return %c0_i32, %1, %c0_i32_0, %c0_i32_1 : i32, i32, i32, i32
  }
  func.func @transform_2(%arg0: i32) -> (i32, i32, i32, i32) {
    %c0_i32 = arith.constant 0 : i32
    %c0_i32_0 = arith.constant 0 : i32
    %c0_i32_1 = arith.constant 0 : i32
    %c0_i32_2 = arith.constant 0 : i32
    return %c0_i32, %arg0, %c0_i32_0, %c0_i32_1 : i32, i32, i32, i32
  }
}

</mosaic_0001>

<bundles_post_ra>
// kernel: tpu_custom_call.1
= control target key start
LH: loop header
LB: loop body
LE: loop exit
PB: predicated region body
PF: predicated region fallthrough
CT: control target
= control target key end

     0   :  { %s803_s9 = smov 0   ;;  %s805_s10 = smov 0   ;;  %s1009_s0 = inlined_call_operand.vmem [shape: f32[2,16,16,4], index: 0, kind: input, shape index: {}]   ;;  %s1010_s1 = inlined_call_operand.vmem [shape: f32[2,16,16,4], index: 1, kind: input, shape index: {}]   ;;  %s1011_s2 = inlined_call_operand.vmem [shape: f32[2,8,8,4], index: 2, kind: output, shape index: {}]  }
   0x1   :  { %s807_s11 = smov 0   ;;  %s809_s12 = smov 0  }
   0x2   :  { %s811_s13 = smov 0   ;;  %s813_s14 = smov 0  }
   0x3   :  { %s815_s15 = smov 0  }
   0x4 LB: > { %s640_s16 = sadd.s32 4294967295, %s785_s15   ;;  %s840_s17 = sadd.s32 1, %s785_s15   ;;  %s785_s15 = sphi %s815_s15, %s1021_s15   ;;  %s781_s14 = sphi %s813_s14, %s1020_s14   ;;  %s777_s13 = sphi %s811_s13, %s1019_s13   ;;  %s773_s12 = sphi %s809_s12, %s1018_s12   ;;  %s769_s11 = sphi %s807_s11, %s1017_s11   ;;  %s765_s10 = sphi %s805_s10, %s1016_s10   ;;  %s761_s9 = sphi %s803_s9, %s1015_s9  }
   0x5   : > { %s642_s18 = sshll.u32 %s785_s15, 1  ;;  %s21_s19 = sadd.s32 1, %s781_s14 }
   0x6   : > { %s668_s20 = sadd.s32 2, %s642_s18  ;;  %p28_p0 = scmp.ne.s32.totalorder %s781_s14, %s777_s13 }
   0x7   : > { %s18_s21 = ssub.s32 %s642_s18, %s668_s20  ;;  %p29_p1 = scmp.eq.s32.totalorder %s785_s15, 0 }
   0x8   : > { %p19_p2 = scmp.eq.s32.totalorder %s18_s21, 0  ;;  %s45_s22 = sadd.s32 1, %s642_s18 }
   0x9   : > { %p849_p3 = por %p29_p1, %p28_p0  ;;  %s47_s24 = sadd.s32 1, %s668_s20 }
   0xa   : > { %s854_s25 = scalar_select %p19_p2, %s781_s14, %s21_s19  }
   0xb   : > { %s48_s26 = ssub.s32 %s45_s22, %s47_s24  ;;  %s51_s27 = sadd.s32 1, %s773_s12 }
   0xc   : > { %p49_p4 = scmp.eq.s32.totalorder %s48_s26, 0  ;;  %p58_p5 = scmp.ne.s32.totalorder %s773_s12, %s769_s11 }
   0xd   : > { %s74_s28 = ssub.s32 %s785_s15, %s840_s17  ;;  %s77_s29 = sadd.s32 1, %s765_s10 }
   0xe   : > { %s863_s30 = scalar_select %p49_p4, %s773_s12, %s51_s27  }
   0xf   : > { %p867_p6 = por %p58_p5, %p29_p1  ;;  %p75_p7 = scmp.eq.s32.totalorder %s74_s28, 0 }
  0x10   : > { %p87_p8 = scmp.ne.s32.totalorder %s765_s10, %s761_s9  ;;  %p88_p9 = scmp.eq.s32.totalorder %s640_s16, 7 }
  0x11   : > { %s876_s4 = scalar_select %p75_p7, %s765_s10, %s77_s29  }
  0x12   : > { %p878_p10 = por %p88_p9, %p87_p8  ;;  %p647_p11 = scmp.ge.s32.totalorder %s785_s15, 8 }
  0x14   : > { %110 = sbr.rel (%p647_p11) target bundleno = 41 (0x29), region = 16 }
  0x1b   : > { %113 = sbr.rel (!%p849_p3) target bundleno = 34 (0x22), region = 20  ;;  %s115_s6 = sand.u32 (%p849_p3), 1, %s781_s14  }
  0x1c   : > { %s672_s7 = sshll.u32 (%p849_p3), %s785_s15, 5  ;;  %s648_s8 = sshll.u32 (%p849_p3), %s115_s6, 5 }
  0x1d   : > { %s121_s20 = scalar_lea.vmem (%p849_p3), %s1009_s0, %s672_s7  ;;  %s117_s21 = scalar_lea.vmem (%p849_p3), [#allocation2], %s648_s8 }
  0x1e   : > { %v155_v0 = vld [vmem:[%s121_s20] sm:$0xff] (%p849_p3)  ;;  %v157_v1 = vld [vmem:[%s121_s20 + $0x8] sm:$0xff] (%p849_p3) }
  0x1f   : > { %v159_v2 = vld [vmem:[%s121_s20 + $0x100] sm:$0xff] (%p849_p3)  ;;  %156 = vst [vmem:[%s117_s21] sm:$0xff] (%p849_p3), %v155_v0  ;;  %158 = vst [vmem:[%s117_s21 + $0x8] sm:$0xff] (%p849_p3), %v157_v1  ;;  %v161_v3 = vld [vmem:[%s121_s20 + $0x108] sm:$0xff] (%p849_p3) }
  0x20   : > { %160 = vst [vmem:[%s117_s21 + $0x10] sm:$0xff] (%p849_p3), %v159_v2  ;;  %162 = vst [vmem:[%s117_s21 + $0x18] sm:$0xff] (%p849_p3), %v161_v3 }
  0x22 PF: > { %168 = sbr.rel (!%p867_p6) target bundleno = 41 (0x29), region = 58  ;;  %s170_s22 = sand.u32 (%p867_p6), 1, %s773_s12  }
  0x23   : > { %s673_s23 = sshll.u32 (%p867_p6), %s785_s15, 5  ;;  %s652_s24 = sshll.u32 (%p867_p6), %s170_s22, 5 }
  0x24   : > { %s584_s28 = scalar_lea.vmem (%p867_p6), %s1010_s1, %s673_s23  ;;  %s172_s29 = scalar_lea.vmem (%p867_p6), [#allocation3], %s652_s24 }
  0x25   : > { %v655_v4 = vld [vmem:[%s584_s28 + $0x10] sm:$0xff] (%p867_p6)  ;;  %v656_v5 = vld [vmem:[%s584_s28 + $0x18] sm:$0xff] (%p867_p6) }
  0x26   : > { %v657_v6 = vld [vmem:[%s584_s28 + $0x110] sm:$0xff] (%p867_p6)  ;;  %212 = vst [vmem:[%s172_s29] sm:$0xff] (%p867_p6), %v655_v4  ;;  %214 = vst [vmem:[%s172_s29 + $0x8] sm:$0xff] (%p867_p6), %v656_v5  ;;  %v658_v7 = vld [vmem:[%s584_s28 + $0x118] sm:$0xff] (%p867_p6) }
  0x27   : > { %216 = vst [vmem:[%s172_s29 + $0x10] sm:$0xff] (%p867_p6), %v657_v6  ;;  %218 = vst [vmem:[%s172_s29 + $0x18] sm:$0xff] (%p867_p6), %v658_v7 }
  0x29 PF: > { %p659_p12 = scmp.ge.s32.totalorder %s785_s15, 1  ;;  %p223_p13 = scmp.lt.s32.totalorder %s785_s15, 9 }
  0x2b   : > { %p224_p0 = pnand %p659_p12, %p223_p13 }
  0x2c   : > { %s230_s3 = sand.u32 (!%p224_p0), 1, %s777_s13   ;;  %s237_s6 = sand.u32 (!%p224_p0), 1, %s769_s11   ;;  %v284_v8 = vlaneseq (!%p224_p0)  ;;  %v787_v9 = vmov (!%p224_p0), 1983009808   ;;  %vm364_vm0 = vcmask (!%p224_p0), 25600   ;;  %vm493_vm1 = vcmask (!%p224_p0), 1041409  }
  0x2d   : > { %227 = sbr.rel (%p224_p0) target bundleno = 99 (0x63), region = 96  ;;  %s660_s7 = sshll.u32 (!%p224_p0), %s230_s3, 5  ;;  %v282_v10 = vunpack.c.l.s4 (!%p224_p0), %v787_v9  ;;  %vm495_vm2 = vcmask (!%p224_p0), 1042434   ;;  %vm497_vm3 = vcmask (!%p224_p0), 1043459   ;;  %vm499_vm4 = vcmask (!%p224_p0), 1044484  }
  0x2e   : > { %s661_s8 = sshll.u32 (!%p224_p0), %s237_s6, 5  ;;  %v285_v11 = vshrl.u32 (!%p224_p0), %v284_v8, 7  ;;  %s232_s18 = scalar_lea.vmem (!%p224_p0), [#allocation2], %s660_s7  ;;  %vm501_vm5 = vcmask (!%p224_p0), 1045509   ;;  %vm503_vm6 = vcmask (!%p224_p0), 1046534   ;;  %vm505_vm7 = vcmask (!%p224_p0), 1047559  }
  0x2f   : > { %v264_v12 = vld [vmem:[%s232_s18] sm:$0xff] (!%p224_p0)  ;;  %v265_v13 = vld [vmem:[%s232_s18 + $0x8] sm:$0xff] (!%p224_p0)  ;;  %v266_v14 = vld [vmem:[%s232_s18 + $0x10] sm:$0xff] (!%p224_p0)  ;;  %v283_v15 = vunpack.c.0.s8 (!%p224_p0), %v282_v10  ;;  %s239_s19 = scalar_lea.vmem (!%p224_p0), [#allocation3], %s661_s8  ;;  %s258_s11 = sand.u32 (!%p224_p0), 1, %s761_s9   ;;  %vm516_vm8 = vcmask (!%p224_p0), 31744  }
  0x30   : > { %v267_v16 = vld [vmem:[%s232_s18 + $0x18] sm:$0xff] (!%p224_p0)  ;;  %v268_v17 = vld [vmem:[%s239_s19] sm:$0xff] (!%p224_p0)  ;;  %v269_v18 = vld [vmem:[%s239_s19 + $0x8] sm:$0xff] (!%p224_p0)  ;;  %s662_s13 = sshll.u32 (!%p224_p0), %s258_s11, 4 }
  0x31   : > { %v270_v19 = vld [vmem:[%s239_s19 + $0x10] sm:$0xff] (!%p224_p0)  ;;  %v271_v20 = vld [vmem:[%s239_s19 + $0x18] sm:$0xff] (!%p224_p0)  ;;  %v272_v21 = vmax.f32 (!%p224_p0), %v264_v12, %v268_v17  ;;  %v273_v22 = vmax.f32 (!%p224_p0), %v265_v13, %v269_v18  ;;  %v286_v23 = vsub.s32 (!%p224_p0), %v283_v15, %v285_v11  ;;  %s260_s9 = scalar_lea.vmem (!%p224_p0), [#allocation4], %s662_s13 }
  0x32   : > { %v274_v24 = vmax.f32 (!%p224_p0), %v266_v14, %v270_v19  ;;  %v275_v25 = vmax.f32 (!%p224_p0), %v267_v16, %v271_v20 }
  0x33   : > { %v280_v26 = vcombine.high (!%p224_p0), %v272_v21, %v272_v21  ;;  %v287_v27 = vrot.slane (!%p224_p0), %v272_v21, %v286_v23  ;;  %v297_v28 = vcombine.high (!%p224_p0), %v273_v22, %v273_v22  ;;  %v304_v29 = vrot.slane (!%p224_p0), %v273_v22, %v286_v23 }
  0x34   : > { %v314_v30 = vcombine.high %v274_v24, %v274_v24  ;;  %v901_v31 = vrot.slane %v274_v24, %v286_v23  ;;  %v331_v32 = vcombine.high %v275_v25, %v275_v25  ;;  %v903_v33 = vrot.slane %v275_v25, %v286_v23  ;;  %s664_s20 = sshll.u32 (%p878_p10), %s640_s16, 3 }
  0x35   : > { %v294_v34 = vrot.slane %v280_v26, %v286_v23  ;;  %v295_v35 = vcombine.high %v287_v27, %v287_v27  ;;  %v311_v36 = vrot.slane %v297_v28, %v286_v23  ;;  %v312_v37 = vcombine.high %v304_v29, %v304_v29  ;;  %s527_s23 = scalar_lea.vmem (%p878_p10), %s1011_s2, %s664_s20 }
  0x36   : > { %v905_v38 = vrot.slane %v314_v30, %v286_v23  ;;  %v329_v39 = vcombine.high %v901_v31, %v901_v31  ;;  %v909_v40 = vrot.slane %v331_v32, %v286_v23  ;;  %v346_v41 = vcombine.high %v903_v33, %v903_v33 }
  0x37   : > { %v296_v42 = vcombine.high %v294_v34, %v294_v34  ;;  %v313_v43 = vcombine.high %v311_v36, %v311_v36  ;;  %v365_v44 = vsel %vm364_vm0, %v287_v27, -inf  ;;  %v372_v45 = vsel %vm364_vm0, %v295_v35, -inf }
  0x38   : > { %v330_v46 = vcombine.high %v905_v38, %v905_v38  ;;  %v347_v47 = vcombine.high %v909_v40, %v909_v40  ;;  %v366_v48 = vrot.slane %v365_v44, 4  ;;  %v373_v49 = vrot.slane %v372_v45, 4 }
  0x39   : > { %v379_v50 = vsel %vm364_vm0, %v294_v34, -inf  ;;  %v386_v51 = vsel %vm364_vm0, %v296_v42, -inf  ;;  %v393_v52 = vsel %vm364_vm0, %v304_v29, -inf  ;;  %v400_v53 = vsel %vm364_vm0, %v312_v37, -inf }
  0x3a   : > { %v367_v54 = vmax.f32 %v365_v44, %v366_v48  ;;  %v374_v55 = vmax.f32 %v372_v45, %v373_v49  ;;  %v380_v56 = vrot.slane %v379_v50, 4  ;;  %v387_v57 = vrot.slane %v386_v51, 4 }
  0x3b   : > { %v394_v58 = vrot.slane %v393_v52, 4  ;;  %v401_v59 = vrot.slane %v400_v53, 4  ;;  %v407_v60 = vsel %vm364_vm0, %v311_v36, -inf  ;;  %v414_v61 = vsel %vm364_vm0, %v313_v43, -inf }
  0x3c   : > { %v368_v62 = vrot.slane %v367_v54, 2  ;;  %v375_v63 = vrot.slane %v374_v55, 2  ;;  %v381_v0 = vmax.f32 %v379_v50, %v380_v56  ;;  %v388_v1 = vmax.f32 %v386_v51, %v387_v57 }
  0x3d   : > { %v395_v2 = vmax.f32 %v393_v52, %v394_v58  ;;  %v402_v3 = vmax.f32 %v400_v53, %v401_v59  ;;  %v408_v4 = vrot.slane %v407_v60, 4  ;;  %v415_v5 = vrot.slane %v414_v61, 4 }
  0x3e   : > { %v369_v6 = vmax.f32 %v367_v54, %v368_v62  ;;  %v376_v7 = vmax.f32 %v374_v55, %v375_v63  ;;  %v382_v8 = vrot.slane %v381_v0, 2  ;;  %v389_v9 = vrot.slane %v388_v1, 2 }
  0x3f   : > { %v396_v10 = vrot.slane %v395_v2, 2  ;;  %v403_v11 = vrot.slane %v402_v3, 2  ;;  %v409_v12 = vmax.f32 %v407_v60, %v408_v4  ;;  %v416_v13 = vmax.f32 %v414_v61, %v415_v5 }
  0x40   : > { %v370_v14 = vrot.slane %v369_v6, 1  ;;  %v377_v15 = vrot.slane %v376_v7, 1  ;;  %v383_v16 = vmax.f32 %v381_v0, %v382_v8  ;;  %v390_v17 = vmax.f32 %v388_v1, %v389_v9 }
  0x41   : > { %v397_v18 = vmax.f32 %v395_v2, %v396_v10  ;;  %v404_v19 = vmax.f32 %v402_v3, %v403_v11  ;;  %v410_v20 = vrot.slane %v409_v12, 2  ;;  %v417_v21 = vrot.slane %v416_v13, 2 }
  0x42   : > { %v925_v22 = vmax.f32 %v369_v6, %v370_v14  ;;  %v927_v23 = vmax.f32 %v376_v7, %v377_v15  ;;  %v384_v24 = vrot.slane %v383_v16, 1  ;;  %v391_v25 = vrot.slane %v390_v17, 1 }
  0x43   : > { %v398_v26 = vrot.slane %v397_v18, 1  ;;  %v405_v27 = vrot.slane %v404_v19, 1  ;;  %v411_v28 = vmax.f32 %v409_v12, %v410_v20  ;;  %v418_v29 = vmax.f32 %v416_v13, %v417_v21 }
  0x44   : > { %v929_v30 = vmax.f32 %v383_v16, %v384_v24  ;;  %v931_v32 = vmax.f32 %v390_v17, %v391_v25  ;;  %v421_v34 = vsel %vm364_vm0, %v901_v31, -inf  ;;  %v428_v35 = vsel %vm364_vm0, %v329_v39, -inf }
  0x45   : > { %v936_v36 = vmax.f32 %v397_v18, %v398_v26  ;;  %v938_v37 = vmax.f32 %v404_v19, %v405_v27  ;;  %v412_v42 = vrot.slane %v411_v28, 1  ;;  %v419_v43 = vrot.slane %v418_v29, 1 }
  0x46   : > { %v422_v44 = vrot.slane %v421_v34, 4  ;;  %v429_v45 = vrot.slane %v428_v35, 4  ;;  %v435_v48 = vsel %vm364_vm0, %v905_v38, -inf  ;;  %v442_v49 = vsel %vm364_vm0, %v330_v46, -inf }
  0x47   : > { %v943_v50 = vmax.f32 %v411_v28, %v412_v42  ;;  %v945_v51 = vmax.f32 %v418_v29, %v419_v43  ;;  %v436_v31 = vrot.slane %v435_v48, 4  ;;  %v443_v52 = vrot.slane %v442_v49, 4 }
  0x48   : > { %v423_v39 = vmax.f32 %v421_v34, %v422_v44  ;;  %v430_v53 = vmax.f32 %v428_v35, %v429_v45  ;;  %v449_v54 = vsel %vm364_vm0, %v903_v33, -inf  ;;  %v456_v55 = vsel %vm364_vm0, %v346_v41, -inf }
  0x49   : > { %v437_v38 = vmax.f32 %v435_v48, %v436_v31  ;;  %v444_v46 = vmax.f32 %v442_v49, %v443_v52  ;;  %v450_v56 = vrot.slane %v449_v54, 4  ;;  %v457_v57 = vrot.slane %v456_v55, 4 }
  0x4a   : > { %v424_v58 = vrot.slane %v423_v39, 2  ;;  %v431_v59 = vrot.slane %v430_v53, 2  ;;  %v463_v60 = vsel %vm364_vm0, %v909_v40, -inf  ;;  %v470_v61 = vsel %vm364_vm0, %v347_v47, -inf }
  0x4b   : > { %v438_v33 = vrot.slane %v437_v38, 2  ;;  %v445_v62 = vrot.slane %v444_v46, 2  ;;  %v451_v41 = vmax.f32 %v449_v54, %v450_v56  ;;  %v458_v63 = vmax.f32 %v456_v55, %v457_v57 }
  0x4c   : > { %v425_v0 = vmax.f32 %v423_v39, %v424_v58  ;;  %v432_v1 = vmax.f32 %v430_v53, %v431_v59  ;;  %v464_v2 = vrot.slane %v463_v60, 4  ;;  %v471_v3 = vrot.slane %v470_v61, 4 }
  0x4d   : > { %v439_v4 = vmax.f32 %v437_v38, %v438_v33  ;;  %v446_v5 = vmax.f32 %v444_v46, %v445_v62  ;;  %v452_v6 = vrot.slane %v451_v41, 2  ;;  %v459_v7 = vrot.slane %v458_v63, 2 }
  0x4e   : > { %v426_v8 = vrot.slane %v425_v0, 1  ;;  %v433_v40 = vrot.slane %v432_v1, 1  ;;  %v465_v9 = vmax.f32 %v463_v60, %v464_v2  ;;  %v472_v47 = vmax.f32 %v470_v61, %v471_v3 }
  0x4f   : > { %v440_v10 = vrot.slane %v439_v4, 1  ;;  %v447_v11 = vrot.slane %v446_v5, 1  ;;  %v453_v12 = vmax.f32 %v451_v41, %v452_v6  ;;  %v460_v13 = vmax.f32 %v458_v63, %v459_v7 }
  0x50   : > { %v427_v14 = vmax.f32 %v425_v0, %v426_v8  ;;  %v434_v15 = vmax.f32 %v432_v1, %v433_v40  ;;  %v466_v16 = vrot.slane %v465_v9, 2  ;;  %v473_v17 = vrot.slane %v472_v47, 2 }
  0x51   : > { %v441_v18 = vmax.f32 %v439_v4, %v440_v10  ;;  %v448_v19 = vmax.f32 %v446_v5, %v447_v11  ;;  %v454_v20 = vrot.slane %v453_v12, 1  ;;  %v461_v21 = vrot.slane %v460_v13, 1 }
  0x52   : > { %v467_v24 = vmax.f32 %v465_v9, %v466_v16  ;;  %v474_v25 = vmax.f32 %v472_v47, %v473_v17  ;;  %v494_v26 = vsel %vm493_vm1, %v927_v23, %v925_v22  ;;  %v507_v27 = vsel %vm493_vm1, %v434_v15, %v427_v14 }
  0x53   : > { %v455_v28 = vmax.f32 %v453_v12, %v454_v20  ;;  %v462_v29 = vmax.f32 %v460_v13, %v461_v21  ;;  %v496_v34 = vsel %vm495_vm2, %v929_v30, %v494_v26  ;;  %v508_v35 = vsel %vm495_vm2, %v441_v18, %v507_v27 }
  0x54   : > { %v468_v42 = vrot.slane %v467_v24, 1  ;;  %v475_v43 = vrot.slane %v474_v25, 1  ;;  %v498_v44 = vsel %vm497_vm3, %v931_v32, %v496_v34  ;;  %v509_v45 = vsel %vm497_vm3, %v448_v19, %v508_v35  ;;  %525 = sbr.rel (!%p878_p10) target bundleno = 99 (0x63), region = 108 }
  0x55   : > { %v500_v22 = vsel %vm499_vm4, %v936_v36, %v498_v44  ;;  %v510_v23 = vsel %vm499_vm4, %v455_v28, %v509_v45 }
  0x56   : > { %v469_v48 = vmax.f32 %v467_v24, %v468_v42  ;;  %v476_v49 = vmax.f32 %v474_v25, %v475_v43  ;;  %v502_v30 = vsel %vm501_vm5, %v938_v37, %v500_v22  ;;  %v511_v31 = vsel %vm501_vm5, %v462_v29, %v510_v23 }
  0x57   : > { %v504_v52 = vsel %vm503_vm6, %v943_v50, %v502_v30 }
  0x58   : > { %v506_v32 = vsel %vm505_vm7, %v945_v51, %v504_v52  ;;  %v512_v39 = vsel %vm503_vm6, %v469_v48, %v511_v31 }
  0x59   : > { %v513_v53 = vsel %vm505_vm7, %v476_v49, %v512_v39  ;;  %517 = vst.msk [vmem:[%s260_s9] sm:$0xff] %vm516_vm8, %v506_v32 }
  0x5a   : > { %518 = vst.msk [vmem:[%s260_s9 + $0x8] sm:$0xff] %vm516_vm8, %v513_v53 }
  0x60   : > { %v557_v36 = vld [vmem:[%s260_s9] sm:$0xff] }
  0x61   : > { %v559_v37 = vld [vmem:[%s260_s9 + $0x8] sm:$0xff]  ;;  %558 = vst [vmem:[%s527_s23] sm:$0xff] %v557_v36 }
  0x62   : > { %560 = vst [vmem:[%s527_s23 + $0x40] sm:$0xff] %v559_v37 }
  0x63 PF: > { %p9_p1 = scmp.ge.s32.totalorder %s840_s17, 10   ;;  %s1015_s9 = smov %s765_s10 }
  0x64   : > { %s1016_s10 = smov %s876_s4  ;;  %s1017_s11 = smov %s773_s12 }
  0x65   : > { %s1018_s12 = smov %s863_s30  ;;  %s1019_s13 = smov %s781_s14 }
  0x66   : > { %s1020_s14 = smov %s854_s25  ;;  %s1021_s15 = smov %s840_s17 }
  0x67   :  { %11 = sbr.rel (!%p9_p1) target bundleno = 4 (0x4), region = 185 }

</bundles_post_ra>
